<compile_context>
chip_gen: v7x
topology: tpu7x:2x2x1
jax: 0.10.0
libtpu: 0.0.40
codegen_flags: <defaults>
</compile_context>

<pallas_src>
import math

import jax
import jax.numpy as jnp
from jax import lax
from jax.experimental import pallas as pl
from jax.experimental.pallas import tpu as pltpu


def _cdiv(a, b):
    return -(-a // b)


def _round_up(v, m):
    return _cdiv(v, m) * m


def _make_kernel(n_rows, rows_tile):
    """Build the PIT-MSE streaming-reduction kernel for a fixed layout."""

    def kernel(s1p_ref, s2p_ref, s1t_ref, s2t_ref, out_ref, acc1, acc2):
        outer = pl.program_id(0)
        inner = pl.program_id(1)
        n_inner = pl.num_programs(1)

        @pl.when(inner == 0)
        def _init():
            acc1[...] = jnp.zeros_like(acc1)
            acc2[...] = jnp.zeros_like(acc2)

        a = s1p_ref[...].astype(jnp.float32)   # s1_pred tile
        b = s2p_ref[...].astype(jnp.float32)   # s2_pred tile
        x = s1t_ref[...].astype(jnp.float32)   # s1 (true) tile
        y = s2t_ref[...].astype(jnp.float32)   # s2 (true) tile

        d11 = a - x
        d22 = b - y
        d12 = a - y
        d21 = b - x
        # Two paired accumulators only (sse11+sse22 and sse12+sse21); pure VPU
        # elementwise work in the hot loop, no cross-lane ops.
        p1 = d11 * d11 + d22 * d22     # permutation (s1p->s1, s2p->s2)
        p2 = d12 * d12 + d21 * d21     # permutation (s1p->s2, s2p->s1)

        # First row covered by this grid step (static arithmetic + program_id).
        row_start = (outer * n_inner + inner) * rows_tile

        @pl.when(row_start + rows_tile <= n_rows)
        def _full_block():
            acc1[...] += p1
            acc2[...] += p2

        @pl.when(row_start + rows_tile > n_rows)
        def _ragged_block():
            # Last (ragged) block and any clamped over-iterated blocks: mask
            # out rows past the true extent.  jnp.where (select) is NaN-safe
            # against whatever garbage sits in the out-of-bounds VMEM region.
            gid = row_start + lax.broadcasted_iota(jnp.int32, p1.shape, 0)
            valid = gid < n_rows
            acc1[...] += jnp.where(valid, p1, 0.0)
            acc2[...] += jnp.where(valid, p2, 0.0)

        @pl.when(inner == n_inner - 1)
        def _finalize():
            sse1 = jnp.sum(acc1[...])
            sse2 = jnp.sum(acc2[...])
            # Pack the two partial SSEs into sublanes 0/1 of this outer
            # index's (8,128) output block (broadcast across lanes).
            row = lax.broadcasted_iota(jnp.int32, out_ref.shape, 0)
            out_ref[...] = jnp.where(
                row == 0, sse1, jnp.where(row == 1, sse2, 0.0)
            ).astype(jnp.float32)

    return kernel


def mse_spec_loss(s1_spec_pred, s2_spec_pred, s1_spec_true, s2_spec_true, *,
                  target_block_bytes=2 * 1024 * 1024,
                  core_split=1,
                  core_parallel=False,
                  buffer_count=2,
                  vmem_limit_bytes=48 * 1024 * 1024):
    """Permutation-invariant mean-MSE loss over two sources. Any input shape."""
    ins = (s1_spec_pred, s2_spec_pred, s1_spec_true, s2_spec_true)
    shape = s1_spec_pred.shape
    dtype = s1_spec_pred.dtype
    assert all(t.shape == shape for t in ins), "all four inputs must share a shape"
    assert all(t.dtype == dtype for t in ins), "all four inputs must share a dtype"
    n = math.prod(shape)
    assert n > 0, "inputs must be non-empty"

    # --- Copy-free 2-D (n_rows, lane) view of each input. --------------------
    # Reshapes of contiguous row-major arrays are bitcasts; no jnp.pad, no
    # slicing, so the kernel streams each input from HBM exactly once.
    lane = None
    for cand in (512, 256, 128):
        if n % cand == 0:
            lane = cand
            break
    if lane is None:
        # Keep the original minor dim as the lane dim (full-extent lane block
        # is always legal).  Lane occupancy may drop but HBM traffic does not.
        lane = shape[-1] if len(shape) > 1 else n
    n_rows = n // lane

    # --- Row tiling from a byte budget (~target_block_bytes per input). ------
    lane_pad = _round_up(lane, 128)                  # VMEM lane padding
    row_bytes = lane_pad * dtype.itemsize
    rows_target = max(16, (target_block_bytes // row_bytes) // 16 * 16)
    if rows_target >= n_rows:
        rows_tile = n_rows        # full extent: always a legal block shape
    else:
        rows_tile = rows_target   # multiple of 16: legal for f32 and bf16 tiles
    # TODO(synk): pathological inputs whose single row exceeds the byte budget
    # (huge minor dim with a non-128-divisible element count) are not
    # sub-tiled along the lane dim.

    nblocks = _cdiv(n_rows, rows_tile)
    n_outer = min(max(int(core_split), 1), nblocks)   # 1 on v5e/v6e, 2 for v7x
    n_inner = _cdiv(nblocks, n_outer)

    ins2d = [t.reshape(n_rows, lane) for t in ins]

    def in_index(o, i):
        # Clamp so no DMA window starts past the array; over-iterated
        # (clamped) blocks are fully masked out in-kernel via row_start.
        return (jnp.minimum(o * n_inner + i, nblocks - 1), 0)

    spec_kwargs = {}
    if buffer_count is not None and buffer_count != 2:
        spec_kwargs["pipeline_mode"] = pl.Buffered(buffer_count)  # v7x sweep knob
    in_spec = pl.BlockSpec((rows_tile, lane), in_index, **spec_kwargs)
    out_spec = pl.BlockSpec((8, 128), lambda o, i: (0, o))

    # Plain PARALLEL on the outer axis is a no-op on 1-TC chips; on v7x ask for
    # a genuine 2-TensorCore split with core_parallel=True (verify in trace).
    outer_sem = (pltpu.CORE_PARALLEL
                 if (core_parallel and n_outer > 1) else pltpu.PARALLEL)

    partials = pl.pallas_call(
        _make_kernel(n_rows, rows_tile),
        out_shape=jax.ShapeDtypeStruct((8, 128 * n_outer), jnp.float32),
        grid_spec=pltpu.PrefetchScalarGridSpec(
            num_scalar_prefetch=0,
            grid=(n_outer, n_inner),
            in_specs=[in_spec, in_spec, in_spec, in_spec],
            out_specs=out_spec,
            scratch_shapes=[pltpu.VMEM((rows_tile, lane), jnp.float32),
                            pltpu.VMEM((rows_tile, lane), jnp.float32)],
        ),
        compiler_params=pltpu.CompilerParams(
            dimension_semantics=(outer_sem, pltpu.ARBITRARY),
            # 4 inputs x 2 bufs x ~2 MiB + 2 f32 accumulators + output
            # ~= 20-25 MiB; 48 MiB is safe on v5e/v6e (128 MiB) and v7x (64).
            vmem_limit_bytes=vmem_limit_bytes,
        ),
    )(*ins2d)

    # Combine per-core partial SSEs; the handful of scalar ops (divide by N,
    # permutation min) stay in the wrapper.
    sse = partials.reshape(8, n_outer, 128)[:2, :, 0].sum(axis=1)
    inv_2n = 0.5 / float(n)
    loss_perm_1 = sse[0] * inv_2n
    loss_perm_2 = sse[1] * inv_2n
    return {"loss": jnp.minimum(loss_perm_1, loss_perm_2)}


def _reference(s1_pred, s2_pred, s1, s2):
    def mse(p, t):
        return jnp.mean((p.astype(jnp.float32) - t.astype(jnp.float32)) ** 2)
    p1 = (mse(s1_pred, s1) + mse(s2_pred, s2)) / 2
    p2 = (mse(s1_pred, s2) + mse(s2_pred, s1)) / 2
    return jnp.minimum(p1, p2)


if __name__ == "__main__":
    key = jax.random.PRNGKey(0)
    k_main, k_odd = jax.random.split(key)
    km = jax.random.split(k_main, 4)
    ko = jax.random.split(k_odd, 4)

    # Spectrogram-like shapes: (batch, freq_bins, frames).
    B, F, T = 2, 64, 128
    s1p = jax.random.normal(km[0], (B, F, T), dtype=jnp.float32)
    s2p = jax.random.normal(km[1], (B, F, T), dtype=jnp.float32)
    s1t = jax.random.normal(km[2], (B, F, T), dtype=jnp.float32)
    s2t = jax.random.normal(km[3], (B, F, T), dtype=jnp.float32)
    ref = _reference(s1p, s2p, s1t, s2t)

    # 1) Default config: lane-dense layout, single block at this tiny size.
    out = mse_spec_loss(s1p, s2p, s1t, s2t)
    loss = jax.block_until_ready(out["loss"])
    assert jnp.allclose(loss, ref, rtol=1e-5, atol=1e-6), (loss, ref)

    # 2) Force multi-block + two-outer-block (per-core partials) path.
    out2 = mse_spec_loss(s1p, s2p, s1t, s2t,
                         target_block_bytes=16 * 512 * 4, core_split=2)
    loss2 = jax.block_until_ready(out2["loss"])
    assert jnp.allclose(loss2, ref, rtol=1e-5, atol=1e-6), (loss2, ref)

    # 3) bf16 inputs go through at native width (cast to f32 in-kernel).
    s1pb, s2pb = s1p.astype(jnp.bfloat16), s2p.astype(jnp.bfloat16)
    s1tb, s2tb = s1t.astype(jnp.bfloat16), s2t.astype(jnp.bfloat16)
    refb = _reference(s1pb, s2pb, s1tb, s2tb)
    outb = mse_spec_loss(s1pb, s2pb, s1tb, s2tb)
    lossb = jax.block_until_ready(outb["loss"])
    assert jnp.allclose(lossb, refb, rtol=1e-4, atol=1e-5), (lossb, refb)

    # 4) Odd shape that is not (8,128)-alignable: no padding copy, fallback
    #    lane = last dim, single full-extent block.
    odd = (3, 33, 50)
    o1p = jax.random.normal(ko[0], odd, dtype=jnp.float32)
    o2p = jax.random.normal(ko[1], odd, dtype=jnp.float32)
    o1t = jax.random.normal(ko[2], odd, dtype=jnp.float32)
    o2t = jax.random.normal(ko[3], odd, dtype=jnp.float32)
    ref3 = _reference(o1p, o2p, o1t, o2t)
    out3 = mse_spec_loss(o1p, o2p, o1t, o2t)
    loss3 = jax.block_until_ready(out3["loss"])
    assert jnp.allclose(loss3, ref3, rtol=1e-5, atol=1e-6), (loss3, ref3)

    # 5) Same odd shape, tiny blocks + core_split=2: exercises ragged-row
    #    masking, inner-axis accumulation, and the clamped (fully-masked)
    #    over-iterated block.
    out4 = mse_spec_loss(o1p, o2p, o1t, o2t,
                         target_block_bytes=16 * 512, core_split=2)
    loss4 = jax.block_until_ready(out4["loss"])
    assert jnp.allclose(loss4, ref3, rtol=1e-5, atol=1e-6), (loss4, ref3)

    print("KERNEL_OK")
</pallas_src>

<mosaic_0001>
module attributes {stable_mosaic.version = 11 : i64} {
  func.func @kernel(%arg0: i32, %arg1: i32, %arg2: memref<32x512xf32, #tpu.memory_space<vmem>>, %arg3: memref<32x512xf32, #tpu.memory_space<vmem>>, %arg4: memref<32x512xf32, #tpu.memory_space<vmem>>, %arg5: memref<32x512xf32, #tpu.memory_space<vmem>>, %arg6: memref<8x128xf32, #tpu.memory_space<vmem>>, %arg7: memref<32x512xf32, #tpu.memory_space<vmem>>, %arg8: memref<32x512xf32, #tpu.memory_space<vmem>>) attributes {dimension_semantics = [#tpu.dimension_semantics<parallel>, #tpu.dimension_semantics<arbitrary>], iteration_bounds = array<i64: 1, 1>, scalar_prefetch = 0 : i64, scratch_operands = 2 : i64, tpu.core_type = #tpu.core_type<tc>, window_params = [{transform_indices = @transform_0, window_bounds = array<i64: 32, 512>}, {transform_indices = @transform_1, window_bounds = array<i64: 32, 512>}, {transform_indices = @transform_2, window_bounds = array<i64: 32, 512>}, {transform_indices = @transform_3, window_bounds = array<i64: 32, 512>}, {transform_indices = @transform_4, window_bounds = array<i64: 8, 128>}]} {
    %c0_i32 = arith.constant 0 : i32
    %0 = arith.cmpi eq, %arg1, %c0_i32 : i32
    %1 = arith.extui %0 : i1 to i32
    %c0_i32_0 = arith.constant 0 : i32
    %2 = arith.cmpi ne, %1, %c0_i32_0 : i32
    scf.if %2 {
      %cst = arith.constant 0.000000e+00 : f32
      %31 = vector.broadcast %cst : f32 to vector<32x512xf32>
      %c0_16 = arith.constant 0 : index
      %c0_17 = arith.constant 0 : index
      %32 = vector.load %arg7[%c0_16, %c0_17] : memref<32x512xf32, #tpu.memory_space<vmem>>, vector<32x512xf32>
      tpu.vector_store %arg7[%c0_16, %c0_17], %31 {strides = array<i32>} : memref<32x512xf32, #tpu.memory_space<vmem>>, vector<32x512xf32>,
      %cst_18 = arith.constant 0.000000e+00 : f32
      %33 = vector.broadcast %cst_18 : f32 to vector<32x512xf32>
      %c0_19 = arith.constant 0 : index
      %c0_20 = arith.constant 0 : index
      %34 = vector.load %arg8[%c0_19, %c0_20] : memref<32x512xf32, #tpu.memory_space<vmem>>, vector<32x512xf32>
      tpu.vector_store %arg8[%c0_19, %c0_20], %33 {strides = array<i32>} : memref<32x512xf32, #tpu.memory_space<vmem>>, vector<32x512xf32>,
    } else {
    }
    %c0 = arith.constant 0 : index
    %c0_1 = arith.constant 0 : index
    %3 = vector.load %arg2[%c0, %c0_1] : memref<32x512xf32, #tpu.memory_space<vmem>>, vector<32x512xf32>
    %c0_2 = arith.constant 0 : index
    %c0_3 = arith.constant 0 : index
    %4 = vector.load %arg3[%c0_2, %c0_3] : memref<32x512xf32, #tpu.memory_space<vmem>>, vector<32x512xf32>
    %c0_4 = arith.constant 0 : index
    %c0_5 = arith.constant 0 : index
    %5 = vector.load %arg4[%c0_4, %c0_5] : memref<32x512xf32, #tpu.memory_space<vmem>>, vector<32x512xf32>
    %c0_6 = arith.constant 0 : index
    %c0_7 = arith.constant 0 : index
    %6 = vector.load %arg5[%c0_6, %c0_7] : memref<32x512xf32, #tpu.memory_space<vmem>>, vector<32x512xf32>
    %7 = arith.subf %3, %5 : vector<32x512xf32>
    %8 = arith.subf %4, %6 : vector<32x512xf32>
    %9 = arith.subf %3, %6 : vector<32x512xf32>
    %10 = arith.subf %4, %5 : vector<32x512xf32>
    %11 = arith.mulf %7, %7 : vector<32x512xf32>
    %12 = arith.mulf %8, %8 : vector<32x512xf32>
    %13 = arith.addf %11, %12 : vector<32x512xf32>
    %14 = arith.mulf %9, %9 : vector<32x512xf32>
    %15 = arith.mulf %10, %10 : vector<32x512xf32>
    %16 = arith.addf %14, %15 : vector<32x512xf32>
    %c1_i32 = arith.constant 1 : i32
    %17 = arith.muli %arg0, %c1_i32 : i32
    %18 = arith.addi %17, %arg1 : i32
    %c32_i32 = arith.constant 32 : i32
    %19 = arith.muli %18, %c32_i32 : i32
    %c32_i32_8 = arith.constant 32 : i32
    %20 = arith.addi %19, %c32_i32_8 : i32
    %c32_i32_9 = arith.constant 32 : i32
    %21 = arith.cmpi sle, %20, %c32_i32_9 : i32
    %22 = arith.extui %21 : i1 to i32
    %c0_i32_10 = arith.constant 0 : i32
    %23 = arith.cmpi ne, %22, %c0_i32_10 : i32
    scf.if %23 {
      %c0_16 = arith.constant 0 : index
      %c0_17 = arith.constant 0 : index
      %31 = vector.load %arg7[%c0_16, %c0_17] : memref<32x512xf32, #tpu.memory_space<vmem>>, vector<32x512xf32>
      %32 = arith.addf %31, %13 : vector<32x512xf32>
      %c0_18 = arith.constant 0 : index
      %c0_19 = arith.constant 0 : index
      %33 = vector.load %arg7[%c0_18, %c0_19] : memref<32x512xf32, #tpu.memory_space<vmem>>, vector<32x512xf32>
      tpu.vector_store %arg7[%c0_18, %c0_19], %32 {strides = array<i32>} : memref<32x512xf32, #tpu.memory_space<vmem>>, vector<32x512xf32>,
      %c0_20 = arith.constant 0 : index
      %c0_21 = arith.constant 0 : index
      %34 = vector.load %arg8[%c0_20, %c0_21] : memref<32x512xf32, #tpu.memory_space<vmem>>, vector<32x512xf32>
      %35 = arith.addf %34, %16 : vector<32x512xf32>
      %c0_22 = arith.constant 0 : index
      %c0_23 = arith.constant 0 : index
      %36 = vector.load %arg8[%c0_22, %c0_23] : memref<32x512xf32, #tpu.memory_space<vmem>>, vector<32x512xf32>
      tpu.vector_store %arg8[%c0_22, %c0_23], %35 {strides = array<i32>} : memref<32x512xf32, #tpu.memory_space<vmem>>, vector<32x512xf32>,
    } else {
    }
    %c32_i32_11 = arith.constant 32 : i32
    %24 = arith.addi %19, %c32_i32_11 : i32
    %c32_i32_12 = arith.constant 32 : i32
    %25 = arith.cmpi sgt, %24, %c32_i32_12 : i32
    %26 = arith.extui %25 : i1 to i32
    %c0_i32_13 = arith.constant 0 : i32
    %27 = arith.cmpi ne, %26, %c0_i32_13 : i32
    scf.if %27 {
      %31 = tpu.iota {dimensions = array<i32: 0>} : vector<32x512xi32>
      %32 = vector.broadcast %19 : i32 to vector<32x512xi32>
      %33 = arith.addi %32, %31 : vector<32x512xi32>
      %c32_i32_16 = arith.constant 32 : i32
      %34 = vector.broadcast %c32_i32_16 : i32 to vector<32x512xi32>
      %35 = arith.cmpi slt, %33, %34 : vector<32x512xi32>
      %c0_17 = arith.constant 0 : index
      %c0_18 = arith.constant 0 : index
      %36 = vector.load %arg7[%c0_17, %c0_18] : memref<32x512xf32, #tpu.memory_space<vmem>>, vector<32x512xf32>
      %cst = arith.constant 0.000000e+00 : f32
      %37 = vector.broadcast %cst : f32 to vector<32x512xf32>
      %38 = arith.select %35, %13, %37 : vector<32x512xi1>, vector<32x512xf32>
      %39 = arith.addf %36, %38 : vector<32x512xf32>
      %c0_19 = arith.constant 0 : index
      %c0_20 = arith.constant 0 : index
      %40 = vector.load %arg7[%c0_19, %c0_20] : memref<32x512xf32, #tpu.memory_space<vmem>>, vector<32x512xf32>
      tpu.vector_store %arg7[%c0_19, %c0_20], %39 {strides = array<i32>} : memref<32x512xf32, #tpu.memory_space<vmem>>, vector<32x512xf32>,
      %c0_21 = arith.constant 0 : index
      %c0_22 = arith.constant 0 : index
      %41 = vector.load %arg8[%c0_21, %c0_22] : memref<32x512xf32, #tpu.memory_space<vmem>>, vector<32x512xf32>
      %cst_23 = arith.constant 0.000000e+00 : f32
      %42 = vector.broadcast %cst_23 : f32 to vector<32x512xf32>
      %43 = arith.select %35, %16, %42 : vector<32x512xi1>, vector<32x512xf32>
      %44 = arith.addf %41, %43 : vector<32x512xf32>
      %c0_24 = arith.constant 0 : index
      %c0_25 = arith.constant 0 : index
      %45 = vector.load %arg8[%c0_24, %c0_25] : memref<32x512xf32, #tpu.memory_space<vmem>>, vector<32x512xf32>
      tpu.vector_store %arg8[%c0_24, %c0_25], %44 {strides = array<i32>} : memref<32x512xf32, #tpu.memory_space<vmem>>, vector<32x512xf32>,
    } else {
    }
    %c0_i32_14 = arith.constant 0 : i32
    %28 = arith.cmpi eq, %arg1, %c0_i32_14 : i32
    %29 = arith.extui %28 : i1 to i32
    %c0_i32_15 = arith.constant 0 : i32
    %30 = arith.cmpi ne, %29, %c0_i32_15 : i32
    scf.if %30 {
      %c0_16 = arith.constant 0 : index
      %c0_17 = arith.constant 0 : index
      %31 = vector.load %arg7[%c0_16, %c0_17] : memref<32x512xf32, #tpu.memory_space<vmem>>, vector<32x512xf32>
      %32 = vector.shape_cast %31 : vector<32x512xf32> to vector<1x32x512xf32>
      %cst = arith.constant dense<0.000000e+00> : vector<1xf32>
      %33 = vector.multi_reduction <add>, %32, %cst [1, 2] : vector<1x32x512xf32> to vector<1xf32>
      %34 = vector.shape_cast %33 : vector<1xf32> to vector<1x1x1xf32>
      %35 = vector.extract %34[0, 0, 0] : f32 from vector<1x1x1xf32>
      %c0_18 = arith.constant 0 : index
      %c0_19 = arith.constant 0 : index
      %36 = vector.load %arg8[%c0_18, %c0_19] : memref<32x512xf32, #tpu.memory_space<vmem>>, vector<32x512xf32>
      %37 = vector.shape_cast %36 : vector<32x512xf32> to vector<1x32x512xf32>
      %cst_20 = arith.constant dense<0.000000e+00> : vector<1xf32>
      %38 = vector.multi_reduction <add>, %37, %cst_20 [1, 2] : vector<1x32x512xf32> to vector<1xf32>
      %39 = vector.shape_cast %38 : vector<1xf32> to vector<1x1x1xf32>
      %40 = vector.extract %39[0, 0, 0] : f32 from vector<1x1x1xf32>
      %41 = tpu.iota {dimensions = array<i32: 0>} : vector<8x128xi32>
      %c0_i32_21 = arith.constant 0 : i32
      %42 = vector.broadcast %c0_i32_21 : i32 to vector<8x128xi32>
      %43 = arith.cmpi eq, %41, %42 : vector<8x128xi32>
      %c1_i32_22 = arith.constant 1 : i32
      %44 = vector.broadcast %c1_i32_22 : i32 to vector<8x128xi32>
      %45 = arith.cmpi eq, %41, %44 : vector<8x128xi32>
      %cst_23 = arith.constant 0.000000e+00 : f32
      %46 = vector.broadcast %40 : f32 to vector<8x128xf32>
      %47 = vector.broadcast %cst_23 : f32 to vector<8x128xf32>
      %48 = arith.select %45, %46, %47 : vector<8x128xi1>, vector<8x128xf32>
      %49 = vector.broadcast %35 : f32 to vector<8x128xf32>
      %50 = arith.select %43, %49, %48 : vector<8x128xi1>, vector<8x128xf32>
      %c0_24 = arith.constant 0 : index
      %c0_25 = arith.constant 0 : index
      %51 = vector.load %arg6[%c0_24, %c0_25] : memref<8x128xf32, #tpu.memory_space<vmem>>, vector<8x128xf32>
      tpu.vector_store %arg6[%c0_24, %c0_25], %50 {strides = array<i32>} : memref<8x128xf32, #tpu.memory_space<vmem>>, vector<8x128xf32>,
    } else {
    }
    return
  }
  func.func @transform_0(%arg0: i32, %arg1: i32) -> (i32, i32) {
    %c1_i32 = arith.constant 1 : i32
    %0 = arith.muli %arg0, %c1_i32 : i32
    %1 = arith.addi %0, %arg1 : i32
    %c0_i32 = arith.constant 0 : i32
    %2 = arith.minsi %1, %c0_i32 : i32
    %c0_i32_0 = arith.constant 0 : i32
    %c0_i32_1 = arith.constant 0 : i32
    return %2, %c0_i32_0 : i32, i32
  }
  func.func @transform_1(%arg0: i32, %arg1: i32) -> (i32, i32) {
    %c1_i32 = arith.constant 1 : i32
    %0 = arith.muli %arg0, %c1_i32 : i32
    %1 = arith.addi %0, %arg1 : i32
    %c0_i32 = arith.constant 0 : i32
    %2 = arith.minsi %1, %c0_i32 : i32
    %c0_i32_0 = arith.constant 0 : i32
    %c0_i32_1 = arith.constant 0 : i32
    return %2, %c0_i32_0 : i32, i32
  }
  func.func @transform_2(%arg0: i32, %arg1: i32) -> (i32, i32) {
    %c1_i32 = arith.constant 1 : i32
    %0 = arith.muli %arg0, %c1_i32 : i32
    %1 = arith.addi %0, %arg1 : i32
    %c0_i32 = arith.constant 0 : i32
    %2 = arith.minsi %1, %c0_i32 : i32
    %c0_i32_0 = arith.constant 0 : i32
    %c0_i32_1 = arith.constant 0 : i32
    return %2, %c0_i32_0 : i32, i32
  }
  func.func @transform_3(%arg0: i32, %arg1: i32) -> (i32, i32) {
    %c1_i32 = arith.constant 1 : i32
    %0 = arith.muli %arg0, %c1_i32 : i32
    %1 = arith.addi %0, %arg1 : i32
    %c0_i32 = arith.constant 0 : i32
    %2 = arith.minsi %1, %c0_i32 : i32
    %c0_i32_0 = arith.constant 0 : i32
    %c0_i32_1 = arith.constant 0 : i32
    return %2, %c0_i32_0 : i32, i32
  }
  func.func @transform_4(%arg0: i32, %arg1: i32) -> (i32, i32) {
    %c0_i32 = arith.constant 0 : i32
    %c0_i32_0 = arith.constant 0 : i32
    return %c0_i32, %arg0 : i32, i32
  }
}

</mosaic_0001>

<bundles_post_ra>
// kernel: tpu_custom_call.1
= control target key start
LH: loop header
LB: loop body
LE: loop exit
PB: predicated region body
PF: predicated region fallthrough
CT: control target
= control target key end

     0   :  { %9 = vsyncpa [#allocation5], 0  ;;  %s1246_s0 = inlined_call_operand.hbm [shape: f32[32,512], index: 0, kind: input, shape index: {}]   ;;  %s1247_s1 = inlined_call_operand.hbm [shape: f32[32,512], index: 1, kind: input, shape index: {}]   ;;  %s1248_s2 = inlined_call_operand.hbm [shape: f32[32,512], index: 2, kind: input, shape index: {}]   ;;  %s1249_s3 = inlined_call_operand.hbm [shape: f32[32,512], index: 3, kind: input, shape index: {}]   ;;  %s1250_s4 = inlined_call_operand.hbm [shape: f32[8,128], index: 4, kind: output, shape index: {}]  }
   0x1   :  { %10 = vsyncpa [#allocation8], 0 }
   0x2   :  { %11 = vsyncpa [#allocation11], 0 }
   0x3   :  { %12 = vsyncpa [#allocation6], 0  ;;  %s872_s15 = smov [#allocation7]   ;;  %s873_s17 = smov [#allocation4]  }
   0x4   :  { %s44_s16 = sshll.u32 %s872_s15, 4  ;;  %s25_s18 = sshll.u32 %s873_s17, 4  ;;  %s45_s16 = int_to_ptr.vmem [resolvable:$true] %s44_s16  ;;  %s904_s18 = int_to_ptr.vmem [resolvable:$true] %s25_s18 }
   0x5   :  { %s754_s21 = scalar_lea.hbm %s1247_s1, 2048 }
   0x6   :  { %p755_p0 = scmp.ne.s32.totalorder %s1247_s1, %s754_s21  ;;  %p758_p1 = scmp.lt.u32.totalorder %s754_s21, %s1247_s1 }
   0x8   :  { %p760_p2 = pnand %p758_p1, %p755_p0 }
   0xa   :  { %763 = shalt.err (!%p760_p2)
}
   0xb   :  { %s764_s26 = scalar_lea.vmem %s45_s16, 2048  ;;  %p769_p4 = scmp.lt.s32.totalorder %s45_s16, %s45_s16 }
   0xc   :  { %p765_p3 = scmp.ne.s32.totalorder %s45_s16, %s764_s26  ;;  %p770_p5 = scmp.lt.s32.totalorder %s764_s26, %s764_s26 }
   0xe   :  { %p771_p6 = por %p770_p5, %p769_p4 }
  0x10   :  { %p772_p7 = pnand %p771_p6, %p765_p3 }
  0x12   :  { %775 = shalt.err (!%p772_p7)
}
  0x13   :  { %s874_s27 = smov 512   ;;  %s875_s28 = smov 32  }
  0x14   :  { %50 = dma.hbm_to_vmem [thread:$0]  %s1247_s1, 2048, %s45_s16, [#allocation8], %s874_s27, %s874_s27, %s875_s28  }
  0x15   :  { %s776_s7 = scalar_lea.hbm %s1246_s0, 2048 }
  0x16   :  { %p777_p8 = scmp.ne.s32.totalorder %s1246_s0, %s776_s7  ;;  %p780_p9 = scmp.lt.u32.totalorder %s776_s7, %s1246_s0 }
  0x18   :  { %p782_p10 = pnand %p780_p9, %p777_p8 }
  0x1a   :  { %785 = shalt.err (!%p782_p10)
}
  0x1b   :  { %s786_s12 = scalar_lea.vmem %s904_s18, 2048  ;;  %p791_p12 = scmp.lt.s32.totalorder %s904_s18, %s904_s18 }
  0x1c   :  { %p787_p11 = scmp.ne.s32.totalorder %s904_s18, %s786_s12  ;;  %p792_p13 = scmp.lt.s32.totalorder %s786_s12, %s786_s12 }
  0x1e   :  { %p793_p0 = por %p792_p13, %p791_p12 }
  0x20   :  { %p794_p1 = pnand %p793_p0, %p787_p11 }
  0x22   :  { %797 = shalt.err (!%p794_p1)
}
  0x23   :  { %31 = dma.hbm_to_vmem [thread:$0]  %s1246_s0, 2048, %s904_s18, [#allocation5], %s874_s27, %s874_s27, %s875_s28  }
  0x24   :  { %s876_s14 = smov [#allocation9]   ;;  %s877_s16 = smov [#allocation10]  }
  0x25   :  { %s63_s15 = sshll.u32 %s876_s14, 4  ;;  %s82_s17 = sshll.u32 %s877_s16, 4  ;;  %s64_s15 = int_to_ptr.vmem [resolvable:$true] %s63_s15  ;;  %s941_s17 = int_to_ptr.vmem [resolvable:$true] %s82_s17 }
  0x26   :  { %s798_s21 = scalar_lea.hbm %s1248_s2, 2048 }
  0x27   :  { %p799_p2 = scmp.ne.s32.totalorder %s1248_s2, %s798_s21  ;;  %p802_p3 = scmp.lt.u32.totalorder %s798_s21, %s1248_s2 }
  0x29   :  { %p804_p4 = pnand %p802_p3, %p799_p2 }
  0x2b   :  { %807 = shalt.err (!%p804_p4)
}
  0x2c   :  { %s808_s0 = scalar_lea.vmem %s64_s15, 2048  ;;  %p813_p6 = scmp.lt.s32.totalorder %s64_s15, %s64_s15 }
  0x2d   :  { %p809_p5 = scmp.ne.s32.totalorder %s64_s15, %s808_s0  ;;  %p814_p7 = scmp.lt.s32.totalorder %s808_s0, %s808_s0 }
  0x2f   :  { %p815_p8 = por %p814_p7, %p813_p6 }
  0x31   :  { %p816_p9 = pnand %p815_p8, %p809_p5 }
  0x33   :  { %819 = shalt.err (!%p816_p9)
}
  0x34   :  { %69 = dma.hbm_to_vmem [thread:$0]  %s1248_s2, 2048, %s64_s15, [#allocation8], %s874_s27, %s874_s27, %s875_s28  }
  0x35   :  { %s820_s5 = scalar_lea.hbm %s1249_s3, 2048 }
  0x36   :  { %p821_p10 = scmp.ne.s32.totalorder %s1249_s3, %s820_s5  ;;  %p824_p11 = scmp.lt.u32.totalorder %s820_s5, %s1249_s3 }
  0x38   :  { %p826_p12 = pnand %p824_p11, %p821_p10 }
  0x3a   :  { %829 = shalt.err (!%p826_p12)
}
  0x3b   :  { %s830_s10 = scalar_lea.vmem %s941_s17, 2048  ;;  %p835_p0 = scmp.lt.s32.totalorder %s941_s17, %s941_s17 }
  0x3c   :  { %p831_p13 = scmp.ne.s32.totalorder %s941_s17, %s830_s10  ;;  %p836_p1 = scmp.lt.s32.totalorder %s830_s10, %s830_s10 }
  0x3e   :  { %p837_p2 = por %p836_p1, %p835_p0 }
  0x40   :  { %p838_p3 = pnand %p837_p2, %p831_p13 }
  0x42   :  { %841 = shalt.err (!%p838_p3)
}
  0x43   :  { %88 = dma.hbm_to_vmem [thread:$0]  %s1249_s3, 2048, %s941_s17, [#allocation11], %s874_s27, %s874_s27, %s875_s28  }
  0x44   :  { %864 = dma.done.wait [#allocation5], 2048  }
  0x45   :  { %865 = vsyncadd [#allocation5], 4294965248 }
  0x46   :  { %866 = dma.done.wait [#allocation8], 4096  }
  0x47   :  { %867 = vsyncadd [#allocation8], 4294963200 }
  0x48   :  { %868 = dma.done.wait [#allocation11], 2048  }
  0x49   :  { %869 = vsyncadd [#allocation11], 4294965248  ;;  %v978_v0 = vld [vmem:[#allocation4] sm:$0xff]  ;;  %v980_v1 = vld [vmem:[#allocation4 + $0x8] sm:$0xff]  ;;  %s878_s27 = smov [#allocation12]  }
  0x4a   :  { %v169_v2 = vld [vmem:[#allocation7] sm:$0xff]  ;;  %v982_v3 = vld [vmem:[#allocation7 + $0x8] sm:$0xff]  ;;  %v990_v8 = vld [vmem:[#allocation4 + $0x10] sm:$0xff]  ;;  %s724_s28 = sshll.u32 %s878_s27, 4  ;;  %s725_s28 = int_to_ptr.vmem [resolvable:$true] %s724_s28 }
  0x4b   :  { %v185_v4 = vld [vmem:[#allocation9] sm:$0xff]  ;;  %v984_v5 = vld [vmem:[#allocation9 + $0x8] sm:$0xff]  ;;  %v992_v9 = vld [vmem:[#allocation7 + $0x10] sm:$0xff]  ;;  %s842_s1 = scalar_lea.vmem %s725_s28, 128  ;;  %p847_p5 = scmp.lt.s32.totalorder %s725_s28, %s725_s28 }
  0x4c   :  { %v986_v6 = vld [vmem:[#allocation10] sm:$0xff]  ;;  %v988_v7 = vld [vmem:[#allocation10 + $0x8] sm:$0xff]  ;;  %v994_v10 = vld [vmem:[#allocation9 + $0x10] sm:$0xff]  ;;  %v217_v12 = vsub.f32 %v978_v0, %v185_v4  ;;  %v218_v15 = vsub.f32 %v980_v1, %v984_v5  ;;  %v1076_v62 = vsub.f32 %v169_v2, %v185_v4  ;;  %p843_p4 = scmp.ne.s32.totalorder %s725_s28, %s842_s1  ;;  %p848_p6 = scmp.lt.s32.totalorder %s842_s1, %s842_s1 }
  0x4d   :  { %v996_v11 = vld [vmem:[#allocation10 + $0x10] sm:$0xff]  ;;  %v999_v13 = vld [vmem:[#allocation4 + $0x18] sm:$0xff]  ;;  %v233_v16 = vsub.f32 %v169_v2, %v986_v6  ;;  %v234_v17 = vsub.f32 %v982_v3, %v988_v7  ;;  %v1012_v20 = vld [vmem:[#allocation4 + $0x20] sm:$0xff]  ;;  %v219_v21 = vsub.f32 %v990_v8, %v994_v10 }
  0x4e   :  { %v1001_v14 = vld [vmem:[#allocation9 + $0x18] sm:$0xff]  ;;  %v235_v22 = vsub.f32 %v992_v9, %v996_v11  ;;  %v1018_v23 = vld [vmem:[#allocation7 + $0x20] sm:$0xff]  ;;  %v281_v27 = vmul.f32 %v217_v12, %v217_v12  ;;  %v1026_v28 = vld [vmem:[#allocation4 + $0x28] sm:$0xff]  ;;  %v282_v31 = vmul.f32 %v218_v15, %v218_v15  ;;  %p849_p7 = por %p848_p6, %p847_p5 }
  0x4f   :  { %v1008_v18 = vld [vmem:[#allocation7 + $0x18] sm:$0xff]  ;;  %v1020_v24 = vld [vmem:[#allocation9 + $0x20] sm:$0xff]  ;;  %v220_v26 = vsub.f32 %v999_v13, %v1001_v14  ;;  %v1028_v29 = vld [vmem:[#allocation9 + $0x28] sm:$0xff]  ;;  %v297_v32 = vmul.f32 %v233_v16, %v233_v16  ;;  %v298_v33 = vmul.f32 %v234_v17, %v234_v17  ;;  %v283_v41 = vmul.f32 %v219_v21, %v219_v21 }
  0x50   :  { %v1010_v19 = vld [vmem:[#allocation10 + $0x18] sm:$0xff]  ;;  %v1022_v25 = vld [vmem:[#allocation10 + $0x20] sm:$0xff]  ;;  %1286 = vst [vmem:[#allocation17_spill] sm:$0xff] %v1028_v29  ;;  %v1032_v34 = vld [vmem:[#allocation7 + $0x28] sm:$0xff]  ;;  %v221_v39 = vsub.f32 %v1012_v20, %v1020_v24  ;;  %v299_v42 = vmul.f32 %v235_v22, %v235_v22  ;;  %v222_v46 = vsub.f32 %v1026_v28, %v1028_v29  ;;  %p850_p8 = pnand %p849_p7, %p843_p4 }
  0x51   :  { %v236_v30 = vsub.f32 %v1008_v18, %v1010_v19  ;;  %1287 = vst [vmem:[#allocation18_spill] sm:$0xff] %v1032_v34  ;;  %v1034_v35 = vld [vmem:[#allocation10 + $0x28] sm:$0xff]  ;;  %v1036_v36 = vld [vmem:[#allocation4 + $0x30] sm:$0xff]  ;;  %v1038_v37 = vld [vmem:[#allocation4 + $0x38] sm:$0xff]  ;;  %v237_v40 = vsub.f32 %v1018_v23, %v1022_v25  ;;  %v284_v47 = vmul.f32 %v220_v26, %v220_v26  ;;  %v313_v56 = vadd.f32 %v297_v32, %v281_v27 }
  0x52   :  { %1288 = vst [vmem:[#allocation19_spill] sm:$0xff] %v1036_v36  ;;  %1289 = vst [vmem:[#allocation20_spill] sm:$0xff] %v1038_v37  ;;  %v1040_v38 = vld [vmem:[#allocation9 + $0x30] sm:$0xff]  ;;  %v1046_v43 = vld [vmem:[#allocation4 + $0x40] sm:$0xff]  ;;  %v238_v54 = vsub.f32 %v1032_v34, %v1034_v35  ;;  %v314_v57 = vadd.f32 %v298_v33, %v282_v31  ;;  %v285_v22 = vmul.f32 %v221_v39, %v221_v39 }
  0x53   :  { %1290 = vst [vmem:[#allocation21_spill] sm:$0xff] %v1040_v38  ;;  %1291 = vst [vmem:[#allocation22_spill] sm:$0xff] %v1046_v43  ;;  %v1048_v44 = vld [vmem:[#allocation7 + $0x30] sm:$0xff]  ;;  %v1054_v48 = vld [vmem:[#allocation4 + $0x48] sm:$0xff]  ;;  %v300_v55 = vmul.f32 %v236_v30, %v236_v30  ;;  %v223_v61 = vsub.f32 %v1036_v36, %v1040_v38  ;;  %v301_v26 = vmul.f32 %v237_v40, %v237_v40 }
  0x54   :  { %1292 = vst [vmem:[#allocation23_spill] sm:$0xff] %v1048_v44  ;;  %v1050_v45 = vld [vmem:[#allocation10 + $0x30] sm:$0xff]  ;;  %1294 = vst [vmem:[#allocation25_spill] sm:$0xff] %v1054_v48  ;;  %v1058_v50 = vld [vmem:[#allocation4 + $0x58] sm:$0xff]  ;;  %v315_v27 = vadd.f32 %v299_v42, %v283_v41  ;;  %v286_v33 = vmul.f32 %v222_v46, %v222_v46  ;;  %v1102_v38 = vsub.f32 %v982_v3, %v984_v5 }
  0x55   :  { %1293 = vst [vmem:[#allocation24_spill] sm:$0xff] %v1050_v45  ;;  %v1056_v49 = vld [vmem:[#allocation4 + $0x50] sm:$0xff]  ;;  %1296 = vst [vmem:[#allocation27_spill] sm:$0xff] %v1058_v50  ;;  %v1060_v51 = vld [vmem:[#allocation7 + $0x38] sm:$0xff]  ;;  %v239_v21 = vsub.f32 %v1048_v44, %v1050_v45  ;;  %v645_v46 = vadd.f32 %v314_v57, %v313_v56  ;;  %v287_v57 = vmul.f32 %v223_v61, %v223_v61 }
  0x56   :  { %1295 = vst [vmem:[#allocation26_spill] sm:$0xff] %v1056_v49  ;;  %1297 = vst [vmem:[#allocation28_spill] sm:$0xff] %v1060_v51  ;;  %v1062_v52 = vld [vmem:[#allocation9 + $0x38] sm:$0xff]  ;;  %v1064_v53 = vld [vmem:[#allocation9 + $0x40] sm:$0xff] }
  0x57   :  { %1298 = vst [vmem:[#allocation29_spill] sm:$0xff] %v1062_v52  ;;  %1299 = vst [vmem:[#allocation30_spill] sm:$0xff] %v1064_v53  ;;  %v1068_v58 = vld [vmem:[#allocation7 + $0x40] sm:$0xff]  ;;  %v1070_v59 = vld [vmem:[#allocation9 + $0x48] sm:$0xff]  ;;  %v224_v31 = vsub.f32 %v1038_v37, %v1062_v52  ;;  %v225_v32 = vsub.f32 %v1046_v43, %v1064_v53  ;;  %v302_v37 = vmul.f32 %v238_v54, %v238_v54 }
  0x58   :  { %1300 = vst [vmem:[#allocation31_spill] sm:$0xff] %v1068_v58  ;;  %1301 = vst [vmem:[#allocation32_spill] sm:$0xff] %v1070_v59  ;;  %v1072_v60 = vld [vmem:[#allocation10 + $0x38] sm:$0xff]  ;;  %v1078_v63 = vld [vmem:[#allocation4 + $0x60] sm:$0xff]  ;;  %v316_v53 = vadd.f32 %v300_v55, %v284_v47  ;;  %v226_v36 = vsub.f32 %v1054_v48, %v1070_v59  ;;  %v646_v29 = vadd.f32 %v645_v46, %v315_v27 }
  0x59   :  { %1302 = vst [vmem:[#allocation33_spill] sm:$0xff] %v1072_v60  ;;  %1303 = vst [vmem:[#allocation34_spill] sm:$0xff] %v1078_v63  ;;  %v1080_v12 = vld [vmem:[#allocation4 + $0x68] sm:$0xff]  ;;  %v1082_v15 = vld [vmem:[#allocation9 + $0x50] sm:$0xff]  ;;  %v240_v52 = vsub.f32 %v1060_v51, %v1072_v60  ;;  %v303_v51 = vmul.f32 %v239_v21, %v239_v21  ;;  %v317_v60 = vadd.f32 %v301_v26, %v285_v22 }
  0x5a   :  { %1304 = vst [vmem:[#allocation35_spill] sm:$0xff] %v1080_v12  ;;  %1305 = vst [vmem:[#allocation36_spill] sm:$0xff] %v1082_v15  ;;  %v1084_v16 = vld [vmem:[#allocation9 + $0x58] sm:$0xff]  ;;  %v1086_v17 = vld [vmem:[#allocation10 + $0x40] sm:$0xff]  ;;  %v227_v45 = vsub.f32 %v1056_v49, %v1082_v15  ;;  %v288_v27 = vmul.f32 %v224_v31, %v224_v31 }
  0x5b   :  { %1306 = vst [vmem:[#allocation37_spill] sm:$0xff] %v1084_v16  ;;  %1307 = vst [vmem:[#allocation38_spill] sm:$0xff] %v1086_v17  ;;  %v1090_v30 = vld [vmem:[#allocation4 + $0x70] sm:$0xff]  ;;  %v1092_v2 = vld [vmem:[#allocation7 + $0x48] sm:$0xff]  ;;  %v228_v34 = vsub.f32 %v1058_v50, %v1084_v16  ;;  %v241_v54 = vsub.f32 %v1068_v58, %v1086_v17  ;;  %v304_v46 = vmul.f32 %v240_v52, %v240_v52 }
  0x5c   :  { %1308 = vst [vmem:[#allocation39_spill] sm:$0xff] %v1090_v30  ;;  %1309 = vst [vmem:[#allocation40_spill] sm:$0xff] %v1092_v2  ;;  %v1094_v4 = vld [vmem:[#allocation9 + $0x60] sm:$0xff]  ;;  %v1104_v39 = vld [vmem:[#allocation4 + $0x78] sm:$0xff]  ;;  %v318_v58 = vadd.f32 %v302_v37, %v286_v33  ;;  %v647_v17 = vadd.f32 %v646_v29, %v316_v53  ;;  %v290_v53 = vmul.f32 %v226_v36, %v226_v36 }
  0x5d   :  { %1310 = vst [vmem:[#allocation41_spill] sm:$0xff] %v1094_v4  ;;  %1311 = vst [vmem:[#allocation42_spill] sm:$0xff] %v1104_v39  ;;  %v1106_v40 = vld [vmem:[#allocation7 + $0x50] sm:$0xff]  ;;  %v1108_v41 = vld [vmem:[#allocation9 + $0x68] sm:$0xff]  ;;  %v229_v16 = vsub.f32 %v1078_v63, %v1094_v4  ;;  %v305_v63 = vmul.f32 %v241_v54, %v241_v54  ;;  %v291_v31 = vmul.f32 %v227_v45, %v227_v45 }
  0x5e   :  { %1312 = vst [vmem:[#allocation43_spill] sm:$0xff] %v1108_v41  ;;  %v1110_v42 = vld [vmem:[#allocation9 + $0x70] sm:$0xff]  ;;  %v1112_v44 = vld [vmem:[#allocation10 + $0x48] sm:$0xff]  ;;  %v1116_v43 = vld [vmem:[#allocation7 + $0x58] sm:$0xff]  ;;  %v230_v50 = vsub.f32 %v1080_v12, %v1108_v41  ;;  %v289_v12 = vmul.f32 %v225_v32, %v225_v32 }
  0x5f   :  { %1313 = vst [vmem:[#allocation44_spill] sm:$0xff] %v1110_v42  ;;  %1314 = vst [vmem:[#allocation45_spill] sm:$0xff] %v1112_v44  ;;  %v1118_v3 = vld [vmem:[#allocation7 + $0x60] sm:$0xff]  ;;  %v1120_v5 = vld [vmem:[#allocation9 + $0x78] sm:$0xff]  ;;  %v231_v49 = vsub.f32 %v1090_v30, %v1110_v42  ;;  %v242_v61 = vsub.f32 %v1092_v2, %v1112_v44  ;;  %v319_v2 = vadd.f32 %v303_v51, %v287_v57 }
  0x60   :  { %1315 = vst [vmem:[#allocation46_spill] sm:$0xff] %v1116_v43  ;;  %1316 = vst [vmem:[#allocation47_spill] sm:$0xff] %v1118_v3  ;;  %v1130_v47 = vld [vmem:[#allocation10 + $0x50] sm:$0xff]  ;;  %v1132_v55 = vld [vmem:[#allocation10 + $0x58] sm:$0xff]  ;;  %v232_v4 = vsub.f32 %v1104_v39, %v1120_v5  ;;  %v648_v44 = vadd.f32 %v647_v17, %v317_v60  ;;  %v249_v51 = vsub.f32 %v978_v0, %v986_v6 }
  0x61   :  { %1317 = vst [vmem:[#allocation48_spill] sm:$0xff] %v1120_v5  ;;  %v1134_v56 = vld [vmem:[#allocation10 + $0x60] sm:$0xff]  ;;  %v1136_v59 = vld [vmem:[#allocation7 + $0x68] sm:$0xff]  ;;  %v1138_v48 = vld [vmem:[#allocation7 + $0x70] sm:$0xff]  ;;  %v243_v41 = vsub.f32 %v1106_v40, %v1130_v47  ;;  %v244_v42 = vsub.f32 %v1116_v43, %v1132_v55  ;;  %v306_v33 = vmul.f32 %v242_v61, %v242_v61  ;;  %v320_v5 = vadd.f32 %v304_v46, %v288_v27 }
  0x62   :  { %1318 = vst [vmem:[#allocation49_spill] sm:$0xff] %v1138_v48  ;;  %v1140_v15 = vld [vmem:[#allocation7 + $0x78] sm:$0xff]  ;;  %v1150_v21 = vld [vmem:[#allocation10 + $0x68] sm:$0xff]  ;;  %v1152_v22 = vld [vmem:[#allocation10 + $0x70] sm:$0xff]  ;;  %v245_v30 = vsub.f32 %v1118_v3, %v1134_v56  ;;  %v649_v39 = vadd.f32 %v648_v44, %v318_v58  ;;  %v292_v43 = vmul.f32 %v228_v34, %v228_v34  ;;  %v293_v3 = vmul.f32 %v229_v16, %v229_v16 }
  0x63   :  { %1319 = vst [vmem:[#allocation50_spill] sm:$0xff] %v1140_v15  ;;  %1320 = vst [vmem:[#allocation51_spill] sm:$0xff] %v1152_v22  ;;  %v1154_v26 = vld [vmem:[#allocation10 + $0x78] sm:$0xff]  ;;  %v246_v37 = vsub.f32 %v1136_v59, %v1150_v21  ;;  %v247_v29 = vsub.f32 %v1138_v48, %v1152_v22  ;;  %v307_v32 = vmul.f32 %v243_v41, %v243_v41 }
  0x64   :  { %v248_v52 = vsub.f32 %v1140_v15, %v1154_v26  ;;  %v294_v60 = vmul.f32 %v230_v50, %v230_v50  ;;  %v321_v17 = vadd.f32 %v305_v63, %v289_v12  ;;  %v650_v54 = vadd.f32 %v649_v39, %v319_v2 }
  0x65   :  { %v250_v57 = vsub.f32 %v980_v1, %v988_v7  ;;  %v295_v48 = vmul.f32 %v231_v49, %v231_v49  ;;  %v296_v22 = vmul.f32 %v232_v4, %v232_v4  ;;  %v308_v15 = vmul.f32 %v244_v42, %v244_v42  ;;  %v1324_v42 = vld [vmem:[#allocation19_spill] sm:$0xff] }
  0x66   :  { %v309_v36 = vmul.f32 %v245_v30, %v245_v30  ;;  %v322_v45 = vadd.f32 %v306_v33, %v290_v53  ;;  %v651_v61 = vadd.f32 %v650_v54, %v320_v5  ;;  %v251_v34 = vsub.f32 %v990_v8, %v996_v11  ;;  %v1322_v30 = vld [vmem:[#allocation18_spill] sm:$0xff]  ;;  %v1328_v53 = vld [vmem:[#allocation20_spill] sm:$0xff]  ;;  %v1329_v33 = vld [vmem:[#allocation29_spill] sm:$0xff] }
  0x67   :  { %v267_v44 = vsub.f32 %v992_v9, %v994_v10  ;;  %v323_v58 = vadd.f32 %v307_v32, %v291_v31  ;;  %v252_v0 = vsub.f32 %v999_v13, %v1010_v19  ;;  %v268_v6 = vsub.f32 %v1008_v18, %v1001_v14  ;;  %v1330_v32 = vld [vmem:[#allocation28_spill] sm:$0xff] }
  0x68   :  { %v329_v1 = vmul.f32 %v249_v51, %v249_v51  ;;  %v652_v7 = vadd.f32 %v651_v61, %v321_v17  ;;  %v330_v49 = vmul.f32 %v250_v57, %v250_v57  ;;  %v345_v50 = vmul.f32 %v1076_v62, %v1076_v62  ;;  %v1321_v62 = vld [vmem:[#allocation17_spill] sm:$0xff]  ;;  %v1332_v61 = vld [vmem:[#allocation22_spill] sm:$0xff] }
  0x69   :  { %v346_v63 = vmul.f32 %v1102_v38, %v1102_v38  ;;  %v310_v8 = vmul.f32 %v246_v37, %v246_v37  ;;  %v311_v11 = vmul.f32 %v247_v29, %v247_v29  ;;  %v324_v12 = vadd.f32 %v308_v15, %v292_v43  ;;  %v1327_v29 = vld [vmem:[#allocation33_spill] sm:$0xff] }
  0x6a   :  { %v253_v9 = vsub.f32 %v1012_v20, %v1022_v25  ;;  %v653_v10 = vadd.f32 %v652_v7, %v322_v45  ;;  %v269_v13 = vsub.f32 %v1018_v23, %v1020_v24  ;;  %v331_v14 = vmul.f32 %v251_v34, %v251_v34  ;;  %v1323_v25 = vld [vmem:[#allocation24_spill] sm:$0xff]  ;;  %v1325_v23 = vld [vmem:[#allocation21_spill] sm:$0xff]  ;;  %v1326_v24 = vld [vmem:[#allocation23_spill] sm:$0xff] }
  0x6b   :  { %v347_v18 = vmul.f32 %v267_v44, %v267_v44  ;;  %v325_v19 = vadd.f32 %v309_v36, %v293_v3  ;;  %v254_v16 = vsub.f32 %v1026_v28, %v1034_v35  ;;  %v270_v2 = vsub.f32 %v1322_v30, %v1321_v62  ;;  %v1331_v45 = vld [vmem:[#allocation38_spill] sm:$0xff]  ;;  %v1340_v62 = vld [vmem:[#allocation36_spill] sm:$0xff] }
  0x6c   :  { %v332_v38 = vmul.f32 %v252_v0, %v252_v0  ;;  %v654_v4 = vadd.f32 %v653_v10, %v323_v58  ;;  %v348_v39 = vmul.f32 %v268_v6, %v268_v6  ;;  %v361_v43 = vadd.f32 %v345_v50, %v329_v1  ;;  %v1333_v44 = vld [vmem:[#allocation30_spill] sm:$0xff]  ;;  %v1334_v58 = vld [vmem:[#allocation31_spill] sm:$0xff]  ;;  %v1335_v50 = vld [vmem:[#allocation45_spill] sm:$0xff] }
  0x6d   :  { %v362_v15 = vadd.f32 %v346_v63, %v330_v49  ;;  %v312_v41 = vmul.f32 %v248_v52, %v248_v52  ;;  %v326_v20 = vadd.f32 %v310_v8, %v294_v60  ;;  %v255_v5 = vsub.f32 %v1324_v42, %v1323_v25  ;;  %v1336_v63 = vld [vmem:[#allocation25_spill] sm:$0xff]  ;;  %v1343_v25 = vld [vmem:[#allocation46_spill] sm:$0xff] }
  0x6e   :  { %v271_v27 = vsub.f32 %v1326_v24, %v1325_v23  ;;  %v655_v3 = vadd.f32 %v654_v4, %v324_v12  ;;  %v333_v46 = vmul.f32 %v253_v9, %v253_v9  ;;  %v349_v37 = vmul.f32 %v269_v13, %v269_v13  ;;  %v1338_v12 = vld [vmem:[#allocation40_spill] sm:$0xff] }
  0x6f   :  { %v363_v28 = vadd.f32 %v347_v18, %v331_v14  ;;  %v327_v35 = vadd.f32 %v311_v11, %v295_v48  ;;  %v256_v31 = vsub.f32 %v1328_v53, %v1327_v29  ;;  %v272_v51 = vsub.f32 %v1330_v32, %v1329_v33  ;;  %v1337_v11 = vld [vmem:[#allocation32_spill] sm:$0xff]  ;;  %v1348_v33 = vld [vmem:[#allocation43_spill] sm:$0xff] }
  0x70   :  { %v334_v17 = vmul.f32 %v254_v16, %v254_v16  ;;  %v656_v52 = vadd.f32 %v655_v3, %v325_v19  ;;  %v350_v60 = vmul.f32 %v270_v2, %v270_v2  ;;  %v364_v54 = vadd.f32 %v348_v39, %v332_v38  ;;  %v1339_v19 = vld [vmem:[#allocation26_spill] sm:$0xff] }
  0x71   :  { %v685_v57 = vadd.f32 %v362_v15, %v361_v43  ;;  %v328_v36 = vadd.f32 %v312_v41, %v296_v22  ;;  %v257_v34 = vsub.f32 %v1332_v61, %v1331_v45  ;;  %v273_v0 = vsub.f32 %v1334_v58, %v1333_v44  ;;  %v1341_v15 = vld [vmem:[#allocation27_spill] sm:$0xff]  ;;  %v1352_v45 = vld [vmem:[#allocation49_spill] sm:$0xff] }
  0x72   :  { %v335_v6 = vmul.f32 %v255_v5, %v255_v5  ;;  %v657_v48 = vadd.f32 %v656_v52, %v326_v20  ;;  %v351_v1 = vmul.f32 %v271_v27, %v271_v27  ;;  %v365_v7 = vadd.f32 %v349_v37, %v333_v46  ;;  %v1342_v20 = vld [vmem:[#allocation37_spill] sm:$0xff]  ;;  %v1346_v46 = vld [vmem:[#allocation47_spill] sm:$0xff] }
  0x73   :  { %v686_v49 = vadd.f32 %v685_v57, %v363_v28  ;;  %v258_v8 = vsub.f32 %v1336_v63, %v1335_v50  ;;  %v274_v9 = vsub.f32 %v1338_v12, %v1337_v11  ;;  %v336_v10 = vmul.f32 %v256_v31, %v256_v31  ;;  %v1350_v57 = vld [vmem:[#allocation39_spill] sm:$0xff] }
  0x74   :  { %v658_v13 = vadd.f32 %v657_v48, %v327_v35  ;;  %v352_v22 = vmul.f32 %v272_v51, %v272_v51  ;;  %v366_v14 = vadd.f32 %v350_v60, %v334_v17  ;;  %v259_v16 = vsub.f32 %v1339_v19, %v1130_v47  ;;  %v1344_v47 = vld [vmem:[#allocation34_spill] sm:$0xff]  ;;  %v1354_v48 = vld [vmem:[#allocation48_spill] sm:$0xff] }
  0x75   :  { %v687_v18 = vadd.f32 %v686_v49, %v364_v54  ;;  %v275_v30 = vsub.f32 %v1106_v40, %v1340_v62  ;;  %v337_v2 = vmul.f32 %v257_v34, %v257_v34  ;;  %v353_v4 = vmul.f32 %v273_v0, %v273_v0  ;;  %v1345_v40 = vld [vmem:[#allocation41_spill] sm:$0xff]  ;;  %v1349_v54 = vld [vmem:[#allocation51_spill] sm:$0xff] }
  0x76   :  { %v659_v38 = vadd.f32 %v658_v13, %v328_v36  ;;  %v367_v39 = vadd.f32 %v351_v1, %v335_v6  ;;  %v260_v41 = vsub.f32 %v1341_v15, %v1132_v55  ;;  %v276_v42 = vsub.f32 %v1343_v25, %v1342_v20  ;;  %v1347_v55 = vld [vmem:[#allocation35_spill] sm:$0xff]  ;;  %v1351_v36 = vld [vmem:[#allocation44_spill] sm:$0xff]  ;;  %v1353_v6 = vld [vmem:[#allocation42_spill] sm:$0xff] }
  0x77   :  { %v688_v43 = vadd.f32 %v687_v18, %v365_v7  ;;  %v338_v5 = vmul.f32 %v258_v8, %v258_v8  ;;  %v354_v23 = vmul.f32 %v274_v9, %v274_v9  ;;  %v368_v24 = vadd.f32 %v352_v22, %v336_v10  ;;  %v1355_v1 = vld [vmem:[#allocation50_spill] sm:$0xff] }
  0x78   :  { %660 = vadd.xlane.f32.xlu0 %v659_v38  ;;  %v261_v3 = vsub.f32 %v1344_v47, %v1134_v56  ;;  %v277_v37 = vsub.f32 %v1346_v46, %v1345_v40  ;;  %v339_v28 = vmul.f32 %v259_v16, %v259_v16  ;;  %v355_v35 = vmul.f32 %v275_v30, %v275_v30 }
  0x79   :  { %v689_v27 = vadd.f32 %v688_v43, %v366_v14  ;;  %v369_v29 = vadd.f32 %v353_v4, %v337_v2  ;;  %v262_v31 = vsub.f32 %v1347_v55, %v1150_v21  ;;  %v278_v32 = vsub.f32 %v1136_v59, %v1348_v33 }
  0x7a   :  { %v340_v51 = vmul.f32 %v260_v41, %v260_v41  ;;  %v356_v17 = vmul.f32 %v276_v42, %v276_v42  ;;  %v370_v52 = vadd.f32 %v354_v23, %v338_v5  ;;  %v263_v56 = vsub.f32 %v1350_v57, %v1349_v54 }
  0x7b   :  { %v690_v53 = vadd.f32 %v689_v27, %v367_v39  ;;  %v279_v61 = vsub.f32 %v1352_v45, %v1351_v36  ;;  %v341_v34 = vmul.f32 %v261_v3, %v261_v3  ;;  %v357_v44 = vmul.f32 %v277_v37, %v277_v37 }
  0x7c   :  { %v371_v58 = vadd.f32 %v355_v35, %v339_v28  ;;  %v264_v21 = vsub.f32 %v1353_v6, %v1154_v26  ;;  %v280_v59 = vsub.f32 %v1355_v1, %v1354_v48  ;;  %v342_v7 = vmul.f32 %v262_v31, %v262_v31 }
  0x7d   :  { %v691_v60 = vadd.f32 %v690_v53, %v368_v24  ;;  %v358_v49 = vmul.f32 %v278_v32, %v278_v32  ;;  %v372_v50 = vadd.f32 %v356_v17, %v340_v51  ;;  %v343_v8 = vmul.f32 %v263_v56, %v263_v56 }
  0x7e   :  { %v359_v11 = vmul.f32 %v279_v61, %v279_v61  ;;  %v373_v12 = vadd.f32 %v357_v44, %v341_v34  ;;  %v344_v10 = vmul.f32 %v264_v21, %v264_v21  ;;  %v360_v13 = vmul.f32 %v280_v59, %v280_v59 }
  0x7f   :  { %v692_v0 = vadd.f32 %v691_v60, %v369_v29  ;;  %v374_v22 = vadd.f32 %v358_v49, %v342_v7  ;;  %v709_v47 = vlaneseq }
  0x80   :  { %v375_v18 = vadd.f32 %v359_v11, %v343_v8  ;;  %v376_v16 = vadd.f32 %v360_v13, %v344_v10 }
  0x81   :  { %v693_v63 = vadd.f32 %v692_v0, %v370_v52  ;;  %v710_v3 = vshrl.u32 %v709_v47, 7 }
  0x83   :  { %v694_v9 = vadd.f32 %v693_v63, %v371_v58  ;;  %vm712_vm0 = vcmp.eq.s32.totalorder %v710_v3, 1  ;;  %vm711_vm1 = vcmp.eq.s32.totalorder %v710_v3, 0 }
  0x85   :  { %v695_v14 = vadd.f32 %v694_v9, %v372_v50 }
  0x87   :  { %v696_v19 = vadd.f32 %v695_v14, %v373_v12 }
  0x89   :  { %v697_v62 = vadd.f32 %v696_v19, %v374_v22 }
  0x8b   :  { %v698_v26 = vadd.f32 %v697_v62, %v375_v18 }
  0x8d   :  { %v699_v30 = vadd.f32 %v698_v26, %v376_v16 }
  0x8f   :  { %700 = vadd.xlane.f32.xlu0 %v699_v30 }
 0x105   :  { %v661_v2 = vpop.xlane.xlu0 %660 }
 0x106   :  { %v662_v38 = vrot.slane %v661_v2, 4 }
 0x108   :  { %v663_v4 = vadd.f32 %v662_v38, %v661_v2 }
 0x10a   :  { %v664_v39 = vrot.slane %v663_v4, 2 }
 0x10c   :  { %v665_v43 = vadd.f32 %v664_v39, %v663_v4 }
 0x10e   :  { %v666_v15 = vrot.slane %v665_v43, 1 }
 0x110   :  { %v667_v41 = vadd.f32 %v666_v15, %v665_v43 }
 0x112   :  { %743 = vpush %v667_v41 }
 0x11c   :  { %v701_v20 = vpop.xlane.xlu0 %700 }
 0x11d   :  { %v702_v25 = vrot.slane %v701_v20, 4 }
 0x11f   :  { %v703_v42 = vadd.f32 %v702_v25, %v701_v20 }
 0x121   :  { %v704_v5 = vrot.slane %v703_v42, 2 }
 0x123   :  { %v705_v23 = vadd.f32 %v704_v5, %v703_v42 }
 0x125   :  { %v706_v24 = vrot.slane %v705_v23, 1 }
 0x127   :  { %v707_v27 = vadd.f32 %v706_v24, %v705_v23 }
 0x129   :  { %745 = vpush %v707_v27 }
 0x143   :  { %s744_s3 = spop %743 }
 0x144   :  { %v715_v46 = vstv %s744_s3 }
 0x15a   :  { %s746_s12 = spop %745 }
 0x15b   :  { %v713_v40 = vstv %s746_s12 }
 0x15c   :  { %v714_v37 = vsel %vm712_vm0, %v713_v40, 0.0 }
 0x15d   :  { %v716_v28 = vsel %vm711_vm1, %v715_v46, %v714_v37 }
 0x15e   :  { %717 = vst [vmem:[#allocation12] sm:$0xff] %v716_v28 }
 0x15f   :  { %853 = shalt.err (!%p850_p8)
}
 0x160   :  { %s854_s15 = scalar_lea.hbm %s1250_s4, 128 }
 0x161   :  { %p855_p9 = scmp.ne.s32.totalorder %s1250_s4, %s854_s15  ;;  %p858_p10 = scmp.lt.u32.totalorder %s854_s15, %s1250_s4 }
 0x163   :  { %p860_p11 = pnand %p858_p10, %p855_p9 }
 0x165   :  { %863 = shalt.err (!%p860_p11)
}
 0x166   :  { %727 = dma.vmem_to_hbm [thread:$0]  %s725_s28, 128, %s1250_s4, [#allocation6]  }
 0x167   :  { %870 = dma.done.wait [#allocation6], 128  }
 0x168   :  { %871 = vsyncadd [#allocation6], 4294967168 }
 0x169   :  { %731 = vsyncpa [#allocation5], 1 }
 0x16a   :  { %732 = vsyncpa [#allocation8], 1 }
 0x16b   :  { %733 = vsyncpa [#allocation11], 1 }
 0x16c   :  { %734 = vsyncpa [#allocation6], 1 }

</bundles_post_ra>
